<compile_context>
chip_gen: v7x
topology: tpu7x:2x2x1
jax: 0.10.0
libtpu: 0.0.40
codegen_flags: <defaults>
</compile_context>

<pallas_src>
import jax
import jax.numpy as jnp
from jax.experimental import pallas as pl
from jax.experimental.pallas import tpu as pltpu


def ranking_kernel(u_ref, c_ref, w1a_ref, w1b_ref, b1_ref, w2_ref, b2_ref, o_ref):
    # h = relu(concat([u, c]) @ W1^T + b1)  ==  relu(u @ W1a + c @ W1b + b1)
    h = jnp.dot(u_ref[...], w1a_ref[...], preferred_element_type=jnp.float32)
    h = h + jnp.dot(c_ref[...], w1b_ref[...], preferred_element_type=jnp.float32)
    # bf16 (or f32 in the escape-hatch mode) h for the fc2 MXU path.
    h = jnp.maximum(h + b1_ref[...], 0.0).astype(w2_ref.dtype)          # (tb, 128)
    # fc2: contract the hidden dim of W2 (1,H) with h (tb,H) -> lane-dense (1,tb).
    # Minor-minor contraction (q@k^T form) -> MXU consumes transposed RHS, no XLU
    # transpose of h; padded rows of a partial last tile are discarded on writeback.
    score = jax.lax.dot_general(
        w2_ref[...], h,
        dimension_numbers=(((1,), (1,)), ((), ())),
        preferred_element_type=jnp.float32)                              # (1, tb)
    o_ref[...] = (score + b2_ref[0]).astype(o_ref.dtype)


def _round_up(x, m):
    return -(-x // m) * m


def _round_down_mult(x, m):
    return (x // m) * m


def _vmem_budget_bytes():
    """Per-generation scoped-VMEM budget (~75% of physical).

    v7x: 64 MiB physical -> ~48 MiB budget; v5e/v6e: 128 MiB -> ~96 MiB.
    Falls back to the conservative v7x-sized budget if the query is unavailable.
    """
    cap = 0
    try:
        cap = int(pltpu.get_tpu_info().vmem_capacity_bytes)
    except Exception:
        cap = 0
    if cap <= 0:
        cap = 64 * 1024 * 1024
    return (cap * 3) // 4


def _pick_tb(batch, emb_dim, budget_bytes, tb_cap):
    """E- and VMEM-aware batch-tile size.

    B < 256: one full-array tile (block == full dim is always legal); otherwise the
    tile is a multiple of 128 (lane-dense (1,tb) output, (tb,E) inputs), grown until
    double-buffered bf16 input tiles + f32 h scratch + residents approach the budget,
    capped by tb_cap, and shrunk if needed so the grid has >= 2 steps (v7x 2nd TC).
    """
    # Per-row VMEM bytes: 2 input arrays * 2 buffers * E * 2B (bf16) + 2 * 4B output
    # row + ~2 KiB margin for the in-kernel f32/bf16 (tb,128) intermediates.
    per_row = 8 * emb_dim + 8 + 2048
    resident = 512 * emb_dim + 8192          # single-buffered W1 halves + b1/W2 + slack
    tb_vmem = max(128, _round_down_mult(max(budget_bytes - resident, 128 * per_row)
                                        // per_row, 128))
    if batch < 128:
        return batch
    tb = max(128, _round_down_mult(min(tb_cap, tb_vmem), 128))
    if tb >= batch:
        if batch < 256:
            return batch                     # single full-array tile
        tb = max(128, _round_up(pl.cdiv(batch, 2), 128))   # >= 2 grid steps
    return tb


def ranking_forward(user_emb, cand_emb, params, *, tb_cap=4096,
                    compute_dtype=jnp.bfloat16, return_flat=False):
    """user_emb, cand_emb: (B, E) float32. Returns (B, 1) float32 (or (B,) if return_flat)."""
    w1, b1, w2, b2 = params["w1"], params["b1"], params["w2"], params["b2"]
    B, E = user_emb.shape
    H = w1.shape[0]                                   # 128
    assert w1.shape == (H, 2 * E)

    budget = _vmem_budget_bytes()
    tb = _pick_tb(B, E, budget, tb_cap)               # sweep tb_cap 2048/4096/8192 in prod
    grid = (pl.cdiv(B, tb),)

    # Glue outside the kernel: split/transpose W1, cast bandwidth-heavy operands.
    w1a = w1[:, :E].T.astype(compute_dtype)           # (E, H) acts on user_emb
    w1b = w1[:, E:].T.astype(compute_dtype)           # (E, H) acts on cand_emb
    u_x = user_emb.astype(compute_dtype)
    c_x = cand_emb.astype(compute_dtype)
    b1r = b1.reshape(1, H).astype(jnp.float32)
    w2r = w2.reshape(1, H).astype(compute_dtype)      # fc2 weights ride in compute dtype
    b2r = b2.reshape(1).astype(jnp.float32)

    def build(resident_buffered):
        def res_spec(shape):
            # Constant index_map => resident; single-buffer to save VMEM when supported.
            if resident_buffered:
                return pl.BlockSpec(shape, lambda i: (0, 0), pipeline_mode=pl.Buffered(1))
            return pl.BlockSpec(shape, lambda i: (0, 0))

        return pl.pallas_call(
            ranking_kernel,
            out_shape=jax.ShapeDtypeStruct((1, B), jnp.float32),   # lane-dense score slab
            grid_spec=pltpu.PrefetchScalarGridSpec(
                num_scalar_prefetch=0,
                grid=grid,
                in_specs=[
                    pl.BlockSpec((tb, E), lambda i: (i, 0)),       # user tile
                    pl.BlockSpec((tb, E), lambda i: (i, 0)),       # cand tile
                    res_spec((E, H)),                              # W1 user-half (resident)
                    res_spec((E, H)),                              # W1 cand-half (resident)
                    res_spec((1, H)),                              # b1 (f32, resident)
                    res_spec((1, H)),                              # W2 row (resident)
                    pl.BlockSpec(memory_space=pltpu.MemorySpace.SMEM),  # b2 scalar
                ],
                out_specs=pl.BlockSpec((1, tb), lambda i: (0, i)),
            ),
            compiler_params=pltpu.CompilerParams(
                dimension_semantics=("parallel",),
                vmem_limit_bytes=budget,
            ),
        )

    args = (u_x, c_x, w1a, w1b, b1r, w2r, b2r)
    try:
        out = build(True)(*args)
    except Exception:
        # Fallback for jax versions without pipeline_mode=pl.Buffered support.
        out = build(False)(*args)

    if return_flat:
        return out.reshape(B)       # skip the (1,B)->(B,1) lane<->sublane relayout
    return out.reshape(B, 1)        # module-spec layout


def init_params(key, emb_dim):
    """Deterministic init mirroring nn.Linear default (uniform +/- 1/sqrt(fan_in))."""
    k1, k2, k3, k4 = jax.random.split(key, 4)
    in1 = emb_dim * 2
    lim1 = 1.0 / jnp.sqrt(in1)
    lim2 = 1.0 / jnp.sqrt(128.0)
    return {
        "w1": jax.random.uniform(k1, (128, in1), jnp.float32, -lim1, lim1),
        "b1": jax.random.uniform(k2, (128,), jnp.float32, -lim1, lim1),
        "w2": jax.random.uniform(k3, (1, 128), jnp.float32, -lim2, lim2),
        "b2": jax.random.uniform(k4, (1,), jnp.float32, -lim2, lim2),
    }


def ranking_ref(user_emb, cand_emb, params):
    """Pure-f32 reference (matches the PyTorch module)."""
    x = jnp.concatenate([user_emb, cand_emb], axis=1)
    h = jnp.maximum(x @ params["w1"].T + params["b1"], 0.0)
    return h @ params["w2"].T + params["b2"]


def ranking_ref_bf16(user_emb, cand_emb, params):
    """Reference matching the kernel's bf16-input / bf16-h / f32-accumulate numerics."""
    E = user_emb.shape[1]
    u = user_emb.astype(jnp.bfloat16)
    c = cand_emb.astype(jnp.bfloat16)
    w1a = params["w1"][:, :E].T.astype(jnp.bfloat16)
    w1b = params["w1"][:, E:].T.astype(jnp.bfloat16)
    h = (jnp.dot(u, w1a, preferred_element_type=jnp.float32)
         + jnp.dot(c, w1b, preferred_element_type=jnp.float32)
         + params["b1"])
    h = jnp.maximum(h, 0.0).astype(jnp.bfloat16)
    w2 = params["w2"].astype(jnp.bfloat16)
    return jnp.dot(h, w2.T, preferred_element_type=jnp.float32) + params["b2"]


if __name__ == "__main__":
    B, E = 8, 32
    key = jax.random.PRNGKey(0)
    ku, kc, kp = jax.random.split(key, 3)
    user_emb = jax.random.normal(ku, (B, E), jnp.float32)
    cand_emb = jax.random.normal(kc, (B, E), jnp.float32)
    params = init_params(kp, E)

    out = jax.block_until_ready(ranking_forward(user_emb, cand_emb, params))
    assert out.shape == (B, 1)
    # Tight check vs the kernel-numerics (bf16) reference; loose vs pure-f32 module.
    assert jnp.allclose(out, ranking_ref_bf16(user_emb, cand_emb, params),
                        atol=2e-2, rtol=2e-2)
    assert jnp.allclose(out, ranking_ref(user_emb, cand_emb, params),
                        atol=7e-2, rtol=7e-2)

    # f32 escape hatch must track the pure-f32 module closely.
    out_f32 = jax.block_until_ready(
        ranking_forward(user_emb, cand_emb, params, compute_dtype=jnp.float32))
    assert jnp.allclose(out_f32, ranking_ref(user_emb, cand_emb, params),
                        atol=1e-4, rtol=1e-4)

    # Multi-tile lane-dense path: B=384 -> tb=256, 2 grid steps, padded last tile.
    B2 = 384
    u2 = jax.random.normal(ku, (B2, E), jnp.float32)
    c2 = jax.random.normal(kc, (B2, E), jnp.float32)
    out2 = jax.block_until_ready(ranking_forward(u2, c2, params))
    assert out2.shape == (B2, 1)
    assert jnp.allclose(out2, ranking_ref_bf16(u2, c2, params), atol=2e-2, rtol=2e-2)

    # Many small tiles + flat-output path (skips the (1,B)->(B,1) relayout).
    out3 = jax.block_until_ready(
        ranking_forward(u2, c2, params, tb_cap=128, return_flat=True))
    assert out3.shape == (B2,)
    assert jnp.allclose(out3, ranking_ref_bf16(u2, c2, params).reshape(-1),
                        atol=2e-2, rtol=2e-2)

    print("KERNEL_OK")
</pallas_src>

<mosaic_0001>
module attributes {stable_mosaic.version = 11 : i64} {
  func.func @ranking_kernel(%arg0: i32, %arg1: memref<8x32xbf16, #tpu.memory_space<vmem>>, %arg2: memref<8x32xbf16, #tpu.memory_space<vmem>>, %arg3: memref<32x128xbf16, #tpu.memory_space<vmem>>, %arg4: memref<32x128xbf16, #tpu.memory_space<vmem>>, %arg5: memref<1x128xf32, #tpu.memory_space<vmem>>, %arg6: memref<1x128xbf16, #tpu.memory_space<vmem>>, %arg7: memref<1xf32, #tpu.memory_space<smem>>, %arg8: memref<1x8xf32, #tpu.memory_space<vmem>>) attributes {dimension_semantics = [#tpu.dimension_semantics<parallel>], iteration_bounds = array<i64: 1>, scalar_prefetch = 0 : i64, scratch_operands = 0 : i64, tpu.core_type = #tpu.core_type<tc>, window_params = [{transform_indices = @transform_0, window_bounds = array<i64: 8, 32>}, {transform_indices = @transform_1, window_bounds = array<i64: 8, 32>}, {pipeline_mode = #tpu.pipeline_mode<synchronous>, transform_indices = @transform_2, window_bounds = array<i64: 32, 128>}, {pipeline_mode = #tpu.pipeline_mode<synchronous>, transform_indices = @transform_3, window_bounds = array<i64: 32, 128>}, {pipeline_mode = #tpu.pipeline_mode<synchronous>, transform_indices = @transform_4, window_bounds = array<i64: 1, 128>}, {pipeline_mode = #tpu.pipeline_mode<synchronous>, transform_indices = @transform_5, window_bounds = array<i64: 1, 128>}, {transform_indices = @transform_6, window_bounds = array<i64: 1>}, {transform_indices = @transform_7, window_bounds = array<i64: 1, 8>}]} {
    %c0 = arith.constant 0 : index
    %c0_0 = arith.constant 0 : index
    %0 = vector.load %arg1[%c0, %c0_0] : memref<8x32xbf16, #tpu.memory_space<vmem>>, vector<8x32xbf16>
    %c0_1 = arith.constant 0 : index
    %c0_2 = arith.constant 0 : index
    %1 = vector.load %arg3[%c0_1, %c0_2] : memref<32x128xbf16, #tpu.memory_space<vmem>>, vector<32x128xbf16>
    %cst = arith.constant dense<0.000000e+00> : vector<8x128xf32>
    %2 = tpu.matmul %0, %1, %cst {dimension_numbers = #tpu.dot_dimension_numbers<[1], [0], [0], [1], [0, 0, 1, 1], [], []>} : vector<8x32xbf16>, vector<32x128xbf16>, vector<8x128xf32> -> vector<8x128xf32>
    %c0_3 = arith.constant 0 : index
    %c0_4 = arith.constant 0 : index
    %3 = vector.load %arg2[%c0_3, %c0_4] : memref<8x32xbf16, #tpu.memory_space<vmem>>, vector<8x32xbf16>
    %c0_5 = arith.constant 0 : index
    %c0_6 = arith.constant 0 : index
    %4 = vector.load %arg4[%c0_5, %c0_6] : memref<32x128xbf16, #tpu.memory_space<vmem>>, vector<32x128xbf16>
    %cst_7 = arith.constant dense<0.000000e+00> : vector<8x128xf32>
    %5 = tpu.matmul %3, %4, %cst_7 {dimension_numbers = #tpu.dot_dimension_numbers<[1], [0], [0], [1], [0, 0, 1, 1], [], []>} : vector<8x32xbf16>, vector<32x128xbf16>, vector<8x128xf32> -> vector<8x128xf32>
    %6 = arith.addf %2, %5 : vector<8x128xf32>
    %c0_8 = arith.constant 0 : index
    %c0_9 = arith.constant 0 : index
    %7 = vector.load %arg5[%c0_8, %c0_9] : memref<1x128xf32, #tpu.memory_space<vmem>>, vector<1x128xf32>
    %8 = vector.broadcast %7 : vector<1x128xf32> to vector<8x128xf32>
    %9 = arith.addf %6, %8 : vector<8x128xf32>
    %cst_10 = arith.constant 0.000000e+00 : f32
    %10 = vector.broadcast %cst_10 : f32 to vector<8x128xf32>
    %11 = arith.maximumf %9, %10 : vector<8x128xf32>
    %12 = arith.truncf %11 : vector<8x128xf32> to vector<8x128xbf16>
    %c0_11 = arith.constant 0 : index
    %c0_12 = arith.constant 0 : index
    %13 = vector.load %arg6[%c0_11, %c0_12] : memref<1x128xbf16, #tpu.memory_space<vmem>>, vector<1x128xbf16>
    %cst_13 = arith.constant dense<0.000000e+00> : vector<1x8xf32>
    %14 = tpu.matmul %13, %12, %cst_13 {dimension_numbers = #tpu.dot_dimension_numbers<[1], [1], [0], [0], [0, 0, 1, 0], [], []>} : vector<1x128xbf16>, vector<8x128xbf16>, vector<1x8xf32> -> vector<1x8xf32>
    %c0_14 = arith.constant 0 : index
    %15 = memref.load %arg7[%c0_14] : memref<1xf32, #tpu.memory_space<smem>>
    %16 = vector.broadcast %15 : f32 to vector<1x8xf32>
    %17 = arith.addf %14, %16 : vector<1x8xf32>
    %c0_15 = arith.constant 0 : index
    %c0_16 = arith.constant 0 : index
    %18 = vector.load %arg8[%c0_15, %c0_16] : memref<1x8xf32, #tpu.memory_space<vmem>>, vector<1x8xf32>
    tpu.vector_store %arg8[%c0_15, %c0_16], %17 {strides = array<i32>} : memref<1x8xf32, #tpu.memory_space<vmem>>, vector<1x8xf32>,
    return
  }
  func.func @transform_0(%arg0: i32) -> (i32, i32) {
    %c0_i32 = arith.constant 0 : i32
    %c0_i32_0 = arith.constant 0 : i32
    return %arg0, %c0_i32 : i32, i32
  }
  func.func @transform_1(%arg0: i32) -> (i32, i32) {
    %c0_i32 = arith.constant 0 : i32
    %c0_i32_0 = arith.constant 0 : i32
    return %arg0, %c0_i32 : i32, i32
  }
  func.func @transform_2(%arg0: i32) -> (i32, i32) {
    %c0_i32 = arith.constant 0 : i32
    %c0_i32_0 = arith.constant 0 : i32
    %c0_i32_1 = arith.constant 0 : i32
    return %c0_i32, %c0_i32_0 : i32, i32
  }
  func.func @transform_3(%arg0: i32) -> (i32, i32) {
    %c0_i32 = arith.constant 0 : i32
    %c0_i32_0 = arith.constant 0 : i32
    %c0_i32_1 = arith.constant 0 : i32
    return %c0_i32, %c0_i32_0 : i32, i32
  }
  func.func @transform_4(%arg0: i32) -> (i32, i32) {
    %c0_i32 = arith.constant 0 : i32
    %c0_i32_0 = arith.constant 0 : i32
    %c0_i32_1 = arith.constant 0 : i32
    return %c0_i32, %c0_i32_0 : i32, i32
  }
  func.func @transform_5(%arg0: i32) -> (i32, i32) {
    %c0_i32 = arith.constant 0 : i32
    %c0_i32_0 = arith.constant 0 : i32
    %c0_i32_1 = arith.constant 0 : i32
    return %c0_i32, %c0_i32_0 : i32, i32
  }
  func.func @transform_6(%arg0: i32) -> i32 {
    %c0_i32 = arith.constant 0 : i32
    %c0_i32_0 = arith.constant 0 : i32
    return %c0_i32 : i32
  }
  func.func @transform_7(%arg0: i32) -> (i32, i32) {
    %c0_i32 = arith.constant 0 : i32
    %c0_i32_0 = arith.constant 0 : i32
    return %c0_i32, %arg0 : i32, i32
  }
}

module attributes {stable_mosaic.version = 11 : i64} {
  func.func @ranking_kernel(%arg0: i32, %arg1: memref<8x32xbf16, #tpu.memory_space<vmem>>, %arg2: memref<8x32xbf16, #tpu.memory_space<vmem>>, %arg3: memref<32x128xbf16, #tpu.memory_space<vmem>>, %arg4: memref<32x128xbf16, #tpu.memory_space<vmem>>, %arg5: memref<1x128xf32, #tpu.memory_space<vmem>>, %arg6: memref<1x128xbf16, #tpu.memory_space<vmem>>, %arg7: memref<1xf32, #tpu.memory_space<smem>>, %arg8: memref<1x8xf32, #tpu.memory_space<vmem>>) attributes {dimension_semantics = [#tpu.dimension_semantics<parallel>], iteration_bounds = array<i64: 1>, scalar_prefetch = 0 : i64, scratch_operands = 0 : i64, tpu.core_type = #tpu.core_type<tc>, window_params = [{transform_indices = @transform_0, window_bounds = array<i64: 8, 32>}, {transform_indices = @transform_1, window_bounds = array<i64: 8, 32>}, {pipeline_mode = #tpu.pipeline_mode<synchronous>, transform_indices = @transform_2, window_bounds = array<i64: 32, 128>}, {pipeline_mode = #tpu.pipeline_mode<synchronous>, transform_indices = @transform_3, window_bounds = array<i64: 32, 128>}, {pipeline_mode = #tpu.pipeline_mode<synchronous>, transform_indices = @transform_4, window_bounds = array<i64: 1, 128>}, {pipeline_mode = #tpu.pipeline_mode<synchronous>, transform_indices = @transform_5, window_bounds = array<i64: 1, 128>}, {transform_indices = @transform_6, window_bounds = array<i64: 1>}, {transform_indices = @transform_7, window_bounds = array<i64: 1, 8>}]} {
    %c0 = arith.constant 0 : index
    %c0_0 = arith.constant 0 : index
    %0 = vector.load %arg1[%c0, %c0_0] : memref<8x32xbf16, #tpu.memory_space<vmem>>, vector<8x32xbf16>
    %c0_1 = arith.constant 0 : index
    %c0_2 = arith.constant 0 : index
    %1 = vector.load %arg3[%c0_1, %c0_2] : memref<32x128xbf16, #tpu.memory_space<vmem>>, vector<32x128xbf16>
    %cst = arith.constant dense<0.000000e+00> : vector<8x128xf32>
    %2 = tpu.matmul %0, %1, %cst {dimension_numbers = #tpu.dot_dimension_numbers<[1], [0], [0], [1], [0, 0, 1, 1], [], []>} : vector<8x32xbf16>, vector<32x128xbf16>, vector<8x128xf32> -> vector<8x128xf32>
    %c0_3 = arith.constant 0 : index
    %c0_4 = arith.constant 0 : index
    %3 = vector.load %arg2[%c0_3, %c0_4] : memref<8x32xbf16, #tpu.memory_space<vmem>>, vector<8x32xbf16>
    %c0_5 = arith.constant 0 : index
    %c0_6 = arith.constant 0 : index
    %4 = vector.load %arg4[%c0_5, %c0_6] : memref<32x128xbf16, #tpu.memory_space<vmem>>, vector<32x128xbf16>
    %cst_7 = arith.constant dense<0.000000e+00> : vector<8x128xf32>
    %5 = tpu.matmul %3, %4, %cst_7 {dimension_numbers = #tpu.dot_dimension_numbers<[1], [0], [0], [1], [0, 0, 1, 1], [], []>} : vector<8x32xbf16>, vector<32x128xbf16>, vector<8x128xf32> -> vector<8x128xf32>
    %6 = arith.addf %2, %5 : vector<8x128xf32>
    %c0_8 = arith.constant 0 : index
    %c0_9 = arith.constant 0 : index
    %7 = vector.load %arg5[%c0_8, %c0_9] : memref<1x128xf32, #tpu.memory_space<vmem>>, vector<1x128xf32>
    %8 = vector.broadcast %7 : vector<1x128xf32> to vector<8x128xf32>
    %9 = arith.addf %6, %8 : vector<8x128xf32>
    %cst_10 = arith.constant 0.000000e+00 : f32
    %10 = vector.broadcast %cst_10 : f32 to vector<8x128xf32>
    %11 = arith.maximumf %9, %10 : vector<8x128xf32>
    %12 = arith.truncf %11 : vector<8x128xf32> to vector<8x128xbf16>
    %c0_11 = arith.constant 0 : index
    %c0_12 = arith.constant 0 : index
    %13 = vector.load %arg6[%c0_11, %c0_12] : memref<1x128xbf16, #tpu.memory_space<vmem>>, vector<1x128xbf16>
    %cst_13 = arith.constant dense<0.000000e+00> : vector<1x8xf32>
    %14 = tpu.matmul %13, %12, %cst_13 {dimension_numbers = #tpu.dot_dimension_numbers<[1], [1], [0], [0], [0, 0, 1, 0], [], []>} : vector<1x128xbf16>, vector<8x128xbf16>, vector<1x8xf32> -> vector<1x8xf32>
    %c0_14 = arith.constant 0 : index
    %15 = memref.load %arg7[%c0_14] : memref<1xf32, #tpu.memory_space<smem>>
    %16 = vector.broadcast %15 : f32 to vector<1x8xf32>
    %17 = arith.addf %14, %16 : vector<1x8xf32>
    %c0_15 = arith.constant 0 : index
    %c0_16 = arith.constant 0 : index
    %18 = vector.load %arg8[%c0_15, %c0_16] : memref<1x8xf32, #tpu.memory_space<vmem>>, vector<1x8xf32>
    tpu.vector_store %arg8[%c0_15, %c0_16], %17 {strides = array<i32>} : memref<1x8xf32, #tpu.memory_space<vmem>>, vector<1x8xf32>,
    return
  }
  func.func @transform_0(%arg0: i32) -> (i32, i32) {
    %c0_i32 = arith.constant 0 : i32
    %c0_i32_0 = arith.constant 0 : i32
    return %arg0, %c0_i32 : i32, i32
  }
  func.func @transform_1(%arg0: i32) -> (i32, i32) {
    %c0_i32 = arith.constant 0 : i32
    %c0_i32_0 = arith.constant 0 : i32
    return %arg0, %c0_i32 : i32, i32
  }
  func.func @transform_2(%arg0: i32) -> (i32, i32) {
    %c0_i32 = arith.constant 0 : i32
    %c0_i32_0 = arith.constant 0 : i32
    %c0_i32_1 = arith.constant 0 : i32
    return %c0_i32, %c0_i32_0 : i32, i32
  }
  func.func @transform_3(%arg0: i32) -> (i32, i32) {
    %c0_i32 = arith.constant 0 : i32
    %c0_i32_0 = arith.constant 0 : i32
    %c0_i32_1 = arith.constant 0 : i32
    return %c0_i32, %c0_i32_0 : i32, i32
  }
  func.func @transform_4(%arg0: i32) -> (i32, i32) {
    %c0_i32 = arith.constant 0 : i32
    %c0_i32_0 = arith.constant 0 : i32
    %c0_i32_1 = arith.constant 0 : i32
    return %c0_i32, %c0_i32_0 : i32, i32
  }
  func.func @transform_5(%arg0: i32) -> (i32, i32) {
    %c0_i32 = arith.constant 0 : i32
    %c0_i32_0 = arith.constant 0 : i32
    %c0_i32_1 = arith.constant 0 : i32
    return %c0_i32, %c0_i32_0 : i32, i32
  }
  func.func @transform_6(%arg0: i32) -> i32 {
    %c0_i32 = arith.constant 0 : i32
    %c0_i32_0 = arith.constant 0 : i32
    return %c0_i32 : i32
  }
  func.func @transform_7(%arg0: i32) -> (i32, i32) {
    %c0_i32 = arith.constant 0 : i32
    %c0_i32_0 = arith.constant 0 : i32
    return %c0_i32, %arg0 : i32, i32
  }
}

</mosaic_0001>

<bundles_post_ra>
// kernel: tpu_custom_call.1
= control target key start
LH: loop header
LB: loop body
LE: loop exit
PB: predicated region body
PF: predicated region fallthrough
CT: control target
= control target key end

     0   :  { %13 = vsyncpa [#allocation4], 0  ;;  %s520_s0 = inlined_call_operand.hbm [shape: bf16[8,32], index: 0, kind: input, shape index: {}]   ;;  %s521_s1 = inlined_call_operand.vmem [shape: bf16[8,32], index: 1, kind: input, shape index: {}]   ;;  %s522_s2 = inlined_call_operand.hbm [shape: bf16[32,128], index: 2, kind: input, shape index: {}]   ;;  %s523_s3 = inlined_call_operand.hbm [shape: bf16[32,128], index: 3, kind: input, shape index: {}]   ;;  %s524_s4 = inlined_call_operand.vmem [shape: f32[1,128], index: 4, kind: input, shape index: {}]   ;;  %s525_s5 = inlined_call_operand.vmem [shape: bf16[1,128], index: 5, kind: input, shape index: {}]   ;;  %s526_s6 = inlined_call_operand.<no memory space> [shape: f32[1], index: 6, kind: input, shape index: {}]   ;;  %s527_s7 = inlined_call_operand.hbm [shape: f32[1,8], index: 7, kind: output, shape index: {}]  }
   0x1   :  { %14 = vsyncpa [#allocation7], 0 }
   0x2   :  { %15 = vsyncpa [#allocation5], 0  ;;  %s403_s24 = smov [#allocation6]   ;;  %s309_s28 = scalar_lea.hbm %s522_s2, 256 }
   0x3   :  { %s33_s25 = sshll.u32 %s403_s24, 4  ;;  %p310_p0 = scmp.ne.s32.totalorder %s522_s2, %s309_s28  ;;  %s34_s25 = int_to_ptr.vmem [resolvable:$true] %s33_s25 }
   0x4   :  { %p313_p1 = scmp.lt.u32.totalorder %s309_s28, %s522_s2 }
   0x6   :  { %p315_p2 = pnand %p313_p1, %p310_p0 }
   0x8   :  { %318 = shalt.err (!%p315_p2)
}
   0x9   :  { %s319_s10 = scalar_lea.vmem %s34_s25, 256  ;;  %p324_p4 = scmp.lt.s32.totalorder %s34_s25, %s34_s25 }
   0xa   :  { %p320_p3 = scmp.ne.s32.totalorder %s34_s25, %s319_s10  ;;  %p325_p5 = scmp.lt.s32.totalorder %s319_s10, %s319_s10 }
   0xc   :  { %p326_p6 = por %p325_p5, %p324_p4 }
   0xe   :  { %p327_p7 = pnand %p326_p6, %p320_p3 }
  0x10   :  { %330 = shalt.err (!%p327_p7)
}
  0x11   :  { %s404_s11 = smov 64   ;;  %s405_s12 = smov 4  }
  0x12   :  { %39 = dma.hbm_to_vmem [thread:$0]  %s522_s2, 256, %s34_s25, [#allocation7], %s404_s11, %s404_s11, %s405_s12  }
  0x13   :  { %s406_s15 = smov [#allocation3]   ;;  %s407_s17 = smov [#allocation8]  }
  0x14   :  { %s22_s16 = sshll.u32 %s406_s15, 4  ;;  %s45_s18 = sshll.u32 %s407_s17, 4  ;;  %s23_s16 = int_to_ptr.vmem [resolvable:$true] %s22_s16  ;;  %s46_s18 = int_to_ptr.vmem [resolvable:$true] %s45_s18 }
  0x15   :  { %s331_s21 = scalar_lea.hbm %s520_s0, 64 }
  0x16   :  { %p332_p8 = scmp.ne.s32.totalorder %s520_s0, %s331_s21  ;;  %p335_p9 = scmp.lt.u32.totalorder %s331_s21, %s520_s0 }
  0x18   :  { %p337_p10 = pnand %p335_p9, %p332_p8 }
  0x1a   :  { %340 = shalt.err (!%p337_p10)
}
  0x1b   :  { %s341_s2 = scalar_lea.vmem %s23_s16, 64  ;;  %p346_p12 = scmp.lt.s32.totalorder %s23_s16, %s23_s16 }
  0x1c   :  { %p342_p11 = scmp.ne.s32.totalorder %s23_s16, %s341_s2  ;;  %p347_p13 = scmp.lt.s32.totalorder %s341_s2, %s341_s2 }
  0x1e   :  { %p348_p0 = por %p347_p13, %p346_p12 }
  0x20   :  { %p349_p1 = pnand %p348_p0, %p342_p11 }
  0x22   :  { %352 = shalt.err (!%p349_p1)
}
  0x23   :  { %25 = dma.hbm_to_vmem [thread:$0]  %s520_s0, 64, %s23_s16, [#allocation4]  }
  0x24   :  { %s353_s30 = scalar_lea.hbm %s523_s3, 256 }
  0x25   :  { %p354_p2 = scmp.ne.s32.totalorder %s523_s3, %s353_s30  ;;  %p357_p3 = scmp.lt.u32.totalorder %s353_s30, %s523_s3 }
  0x27   :  { %p359_p4 = pnand %p357_p3, %p354_p2 }
  0x29   :  { %362 = shalt.err (!%p359_p4)
}
  0x2a   :  { %s363_s14 = scalar_lea.vmem %s46_s18, 256  ;;  %p368_p6 = scmp.lt.s32.totalorder %s46_s18, %s46_s18 }
  0x2b   :  { %p364_p5 = scmp.ne.s32.totalorder %s46_s18, %s363_s14  ;;  %p369_p7 = scmp.lt.s32.totalorder %s363_s14, %s363_s14 }
  0x2d   :  { %p370_p8 = por %p369_p7, %p368_p6 }
  0x2f   :  { %p371_p9 = pnand %p370_p8, %p364_p5 }
  0x31   :  { %374 = shalt.err (!%p371_p9)
}
  0x32   :  { %51 = dma.hbm_to_vmem [thread:$0]  %s523_s3, 256, %s46_s18, [#allocation7], %s404_s11, %s404_s11, %s405_s12  }
  0x33   :  { %397 = dma.done.wait [#allocation4], 64  }
  0x34   :  { %398 = vsyncadd [#allocation4], 4294967232 }
  0x35   :  { %399 = dma.done.wait [#allocation7], 512  }
  0x36   :  { %400 = vsyncadd [#allocation7], 4294966784  ;;  %v408_v0 = vmov 0.0   ;;  %vm409_vm0 = vmmov 0   ;;  %v305_v1 = vld [vmem:[#allocation8] sm:$0xff]   ;;  %v306_v2 = vld [vmem:[#allocation6] sm:$0xff]   ;;  %v201_v21 = vstv %s526_s6 }
  0x37   :  { %275 = vmatprep.subr.bf16.mxu0 %v408_v0  ;;  %283 = vmatprep.subr.bf16.mxu1 %v408_v0  ;;  %v307_v3 = vld [vmem:[#allocation8 + $0x8] sm:$0xff]   ;;  %v308_v4 = vld [vmem:[#allocation6 + $0x8] sm:$0xff]   ;;  %vm90_vm1 = vcmask 261120   ;;  %vm242_vm2 = vcmask 57344  }
  0x38   :  { %279 = vmatprep.mubr.msk.bf16.mxu0 %vm409_vm0, %v408_v0  ;;  %287 = vmatprep.mubr.msk.bf16.mxu1 %vm409_vm0, %v408_v0  ;;  %v73_v5 = vld [vmem:[%s521_s1] sm:$0xf] }
  0x39   :  { %276 = vmatpush3.bf16.msra.mxu0 %v305_v1  ;;  %284 = vmatpush3.bf16.msra.mxu1 %v306_v2  ;;  %v68_v6 = vld [vmem:[#allocation3] sm:$0xf] }
  0x3a   :  { %277 = vmatprep.subr.bf16.mxu0 %v408_v0  ;;  %285 = vmatprep.subr.bf16.mxu1 %v408_v0  ;;  %v266_v9 = vld [vmem:[%s524_s4] ss:$0 sm:$0xff]  ;;  %s410_s4 = smov [#allocation9]  }
  0x3b   :  { %v199_v20 = vld [vmem:[%s525_s5] sm:$0x1]  ;;  %s250_s20 = sshll.u32 %s410_s4, 4  ;;  %s251_s20 = int_to_ptr.vmem [resolvable:$true] %s250_s20 }
  0x3c   :  { %s375_s21 = scalar_lea.vmem %s251_s20, 16  ;;  %s379_s22 = scalar_lea.vmem %s251_s20, 32 }
  0x3d   :  { %278 = vmatpush3.bf16.msra.mxu0 %v307_v3  ;;  %286 = vmatpush3.bf16.msra.mxu1 %v308_v4  ;;  %p376_p10 = scmp.ne.s32.totalorder %s251_s20, %s375_s21  ;;  %p380_p11 = scmp.lt.s32.totalorder %s251_s20, %s251_s20 }
  0x3e   :  { %291 = vmatprep.subr.bf16.mxu0 %v408_v0  ;;  %p381_p12 = scmp.lt.s32.totalorder %s379_s22, %s375_s21 }
  0x40   :  { %280 = vmatmul.mubr.msk.bf16.vlgmr.msra.gmra.mrb[0].mxu0 %vm90_vm1, %v73_v5  ;;  %288 = vmatmul.mubr.msk.bf16.vlgmr.msra.gmra.mrb[0].mxu1 %vm90_vm1, %v68_v6  ;;  %p382_p13 = por %p381_p12, %p380_p11 }
  0x41   :  { %293 = vmatprep.mubr.msk.bf16.mxu0 %vm409_vm0, %v408_v0 }
  0x42   :  { %p383_p0 = pnand %p382_p13, %p376_p10 }
 0x113   :  { %v128_v7 = vpop.f32.mrb[0].mxu0  ;;  %v183_v8 = vpop.f32.mrb[0].mxu1 }
 0x114   :  { %v281_v10 = vpop.f32.mrb[1].mxu0  ;;  %v184_v11 = vadd.f32 %v183_v8, %v128_v7  ;;  %v289_v12 = vpop.f32.mrb[1].mxu1 }
 0x115   :  { %v131_v13 = vpop.f32.mrb[2].mxu0  ;;  %v186_v14 = vpop.f32.mrb[2].mxu1 }
 0x116   :  { %v282_v15 = vpop.f32.mrb[3].mxu0  ;;  %v196_v16 = vadd.f32 %v266_v9, %v184_v11  ;;  %v290_v17 = vpop.f32.mrb[3].mxu1 }
 0x118   :  { %v197_v18 = vmax.f32 %v196_v16, 0.0 }
 0x11a   :  { %v198_v19 = vpack.c.bf16 %v197_v18, %v197_v18 }
 0x11c   :  { %292 = vmatpush3.bf16.xpose.msra.mxu0 %v198_v19 }
 0x123   :  { %294 = vmatmul.mubr.bf16.vlgmr.msra.gmra.mrb[4].mxu0 %v199_v20 }
 0x1f6   :  { %v236_v22 = vpop.f32.mrb[4].mxu0 }
 0x1f7   :  { %v237_v23 = vadd.f32 %v236_v22, %v201_v21  ;;  %v295_v24 = vpop.f32.mrb[5].mxu0 }
 0x1f8   :  { %v239_v25 = vpop.f32.mrb[6].mxu0 }
 0x1f9   :  { %v296_v26 = vpop.f32.mrb[7].mxu0  ;;  %243 = vst.msk [vmem:[#allocation9] sm:$0x1] %vm242_vm2, %v237_v23 }
 0x1fa   :  { %386 = shalt.err (!%p383_p0)
}
 0x1fb   :  { %s387_s23 = scalar_lea.hbm %s527_s7, 16 }
 0x1fc   :  { %p388_p1 = scmp.ne.s32.totalorder %s527_s7, %s387_s23  ;;  %p391_p2 = scmp.lt.u32.totalorder %s387_s23, %s527_s7 }
 0x1fe   :  { %p393_p3 = pnand %p391_p2, %p388_p1 }
 0x200   :  { %396 = shalt.err (!%p393_p3)
}
 0x201   :  { %253 = dma.vmem_to_hbm [thread:$0]  %s251_s20, 16, %s527_s7, [#allocation5]  }
 0x202   :  { %401 = dma.done.wait [#allocation5], 16  }
 0x203   :  { %402 = vsyncadd [#allocation5], 4294967280 }
 0x204   :  { %257 = vsyncpa [#allocation4], 1 }
 0x205   :  { %258 = vsyncpa [#allocation7], 1 }
 0x206   :  { %259 = vsyncpa [#allocation5], 1 }

// kernel: tpu_custom_call.1
= control target key start
LH: loop header
LB: loop body
LE: loop exit
PB: predicated region body
PF: predicated region fallthrough
CT: control target
= control target key end

     0   :  { %13 = vsyncpa [#allocation4], 0  ;;  %s520_s0 = inlined_call_operand.hbm [shape: bf16[8,32], index: 0, kind: input, shape index: {}]   ;;  %s521_s1 = inlined_call_operand.vmem [shape: bf16[8,32], index: 1, kind: input, shape index: {}]   ;;  %s522_s2 = inlined_call_operand.hbm [shape: bf16[32,128], index: 2, kind: input, shape index: {}]   ;;  %s523_s3 = inlined_call_operand.hbm [shape: bf16[32,128], index: 3, kind: input, shape index: {}]   ;;  %s524_s4 = inlined_call_operand.vmem [shape: f32[1,128], index: 4, kind: input, shape index: {}]   ;;  %s525_s5 = inlined_call_operand.vmem [shape: bf16[1,128], index: 5, kind: input, shape index: {}]   ;;  %s526_s6 = inlined_call_operand.<no memory space> [shape: f32[1], index: 6, kind: input, shape index: {}]   ;;  %s527_s7 = inlined_call_operand.hbm [shape: f32[1,8], index: 7, kind: output, shape index: {}]  }
   0x1   :  { %14 = vsyncpa [#allocation7], 0 }
   0x2   :  { %15 = vsyncpa [#allocation5], 0  ;;  %s403_s24 = smov [#allocation6]   ;;  %s309_s28 = scalar_lea.hbm %s522_s2, 256 }
   0x3   :  { %s33_s25 = sshll.u32 %s403_s24, 4  ;;  %p310_p0 = scmp.ne.s32.totalorder %s522_s2, %s309_s28  ;;  %s34_s25 = int_to_ptr.vmem [resolvable:$true] %s33_s25 }
   0x4   :  { %p313_p1 = scmp.lt.u32.totalorder %s309_s28, %s522_s2 }
   0x6   :  { %p315_p2 = pnand %p313_p1, %p310_p0 }
   0x8   :  { %318 = shalt.err (!%p315_p2)
}
   0x9   :  { %s319_s10 = scalar_lea.vmem %s34_s25, 256  ;;  %p324_p4 = scmp.lt.s32.totalorder %s34_s25, %s34_s25 }
   0xa   :  { %p320_p3 = scmp.ne.s32.totalorder %s34_s25, %s319_s10  ;;  %p325_p5 = scmp.lt.s32.totalorder %s319_s10, %s319_s10 }
   0xc   :  { %p326_p6 = por %p325_p5, %p324_p4 }
   0xe   :  { %p327_p7 = pnand %p326_p6, %p320_p3 }
  0x10   :  { %330 = shalt.err (!%p327_p7)
}
  0x11   :  { %s404_s11 = smov 64   ;;  %s405_s12 = smov 4  }
  0x12   :  { %39 = dma.hbm_to_vmem [thread:$0]  %s522_s2, 256, %s34_s25, [#allocation7], %s404_s11, %s404_s11, %s405_s12  }
  0x13   :  { %s406_s15 = smov [#allocation3]   ;;  %s407_s17 = smov [#allocation8]  }
  0x14   :  { %s22_s16 = sshll.u32 %s406_s15, 4  ;;  %s45_s18 = sshll.u32 %s407_s17, 4  ;;  %s23_s16 = int_to_ptr.vmem [resolvable:$true] %s22_s16  ;;  %s46_s18 = int_to_ptr.vmem [resolvable:$true] %s45_s18 }
  0x15   :  { %s331_s21 = scalar_lea.hbm %s520_s0, 64 }
  0x16   :  { %p332_p8 = scmp.ne.s32.totalorder %s520_s0, %s331_s21  ;;  %p335_p9 = scmp.lt.u32.totalorder %s331_s21, %s520_s0 }
  0x18   :  { %p337_p10 = pnand %p335_p9, %p332_p8 }
  0x1a   :  { %340 = shalt.err (!%p337_p10)
}
  0x1b   :  { %s341_s2 = scalar_lea.vmem %s23_s16, 64  ;;  %p346_p12 = scmp.lt.s32.totalorder %s23_s16, %s23_s16 }
  0x1c   :  { %p342_p11 = scmp.ne.s32.totalorder %s23_s16, %s341_s2  ;;  %p347_p13 = scmp.lt.s32.totalorder %s341_s2, %s341_s2 }
  0x1e   :  { %p348_p0 = por %p347_p13, %p346_p12 }
  0x20   :  { %p349_p1 = pnand %p348_p0, %p342_p11 }
  0x22   :  { %352 = shalt.err (!%p349_p1)
}
  0x23   :  { %25 = dma.hbm_to_vmem [thread:$0]  %s520_s0, 64, %s23_s16, [#allocation4]  }
  0x24   :  { %s353_s30 = scalar_lea.hbm %s523_s3, 256 }
  0x25   :  { %p354_p2 = scmp.ne.s32.totalorder %s523_s3, %s353_s30  ;;  %p357_p3 = scmp.lt.u32.totalorder %s353_s30, %s523_s3 }
  0x27   :  { %p359_p4 = pnand %p357_p3, %p354_p2 }
  0x29   :  { %362 = shalt.err (!%p359_p4)
}
  0x2a   :  { %s363_s14 = scalar_lea.vmem %s46_s18, 256  ;;  %p368_p6 = scmp.lt.s32.totalorder %s46_s18, %s46_s18 }
  0x2b   :  { %p364_p5 = scmp.ne.s32.totalorder %s46_s18, %s363_s14  ;;  %p369_p7 = scmp.lt.s32.totalorder %s363_s14, %s363_s14 }
  0x2d   :  { %p370_p8 = por %p369_p7, %p368_p6 }
  0x2f   :  { %p371_p9 = pnand %p370_p8, %p364_p5 }
  0x31   :  { %374 = shalt.err (!%p371_p9)
}
  0x32   :  { %51 = dma.hbm_to_vmem [thread:$0]  %s523_s3, 256, %s46_s18, [#allocation7], %s404_s11, %s404_s11, %s405_s12  }
  0x33   :  { %397 = dma.done.wait [#allocation4], 64  }
  0x34   :  { %398 = vsyncadd [#allocation4], 4294967232 }
  0x35   :  { %399 = dma.done.wait [#allocation7], 512  }
  0x36   :  { %400 = vsyncadd [#allocation7], 4294966784  ;;  %v408_v0 = vmov 0.0   ;;  %vm409_vm0 = vmmov 0   ;;  %v305_v1 = vld [vmem:[#allocation8] sm:$0xff]   ;;  %v306_v2 = vld [vmem:[#allocation6] sm:$0xff]   ;;  %v201_v21 = vstv %s526_s6 }
  0x37   :  { %275 = vmatprep.subr.bf16.mxu0 %v408_v0  ;;  %283 = vmatprep.subr.bf16.mxu1 %v408_v0  ;;  %v307_v3 = vld [vmem:[#allocation8 + $0x8] sm:$0xff]   ;;  %v308_v4 = vld [vmem:[#allocation6 + $0x8] sm:$0xff]   ;;  %vm90_vm1 = vcmask 261120   ;;  %vm242_vm2 = vcmask 57344  }
  0x38   :  { %279 = vmatprep.mubr.msk.bf16.mxu0 %vm409_vm0, %v408_v0  ;;  %287 = vmatprep.mubr.msk.bf16.mxu1 %vm409_vm0, %v408_v0  ;;  %v73_v5 = vld [vmem:[%s521_s1] sm:$0xf] }
  0x39   :  { %276 = vmatpush3.bf16.msra.mxu0 %v305_v1  ;;  %284 = vmatpush3.bf16.msra.mxu1 %v306_v2  ;;  %v68_v6 = vld [vmem:[#allocation3] sm:$0xf] }
  0x3a   :  { %277 = vmatprep.subr.bf16.mxu0 %v408_v0  ;;  %285 = vmatprep.subr.bf16.mxu1 %v408_v0  ;;  %v266_v9 = vld [vmem:[%s524_s4] ss:$0 sm:$0xff]  ;;  %s410_s4 = smov [#allocation9]  }
  0x3b   :  { %v199_v20 = vld [vmem:[%s525_s5] sm:$0x1]  ;;  %s250_s20 = sshll.u32 %s410_s4, 4  ;;  %s251_s20 = int_to_ptr.vmem [resolvable:$true] %s250_s20 }
  0x3c   :  { %s375_s21 = scalar_lea.vmem %s251_s20, 16  ;;  %s379_s22 = scalar_lea.vmem %s251_s20, 32 }
  0x3d   :  { %278 = vmatpush3.bf16.msra.mxu0 %v307_v3  ;;  %286 = vmatpush3.bf16.msra.mxu1 %v308_v4  ;;  %p376_p10 = scmp.ne.s32.totalorder %s251_s20, %s375_s21  ;;  %p380_p11 = scmp.lt.s32.totalorder %s251_s20, %s251_s20 }
  0x3e   :  { %291 = vmatprep.subr.bf16.mxu0 %v408_v0  ;;  %p381_p12 = scmp.lt.s32.totalorder %s379_s22, %s375_s21 }
  0x40   :  { %280 = vmatmul.mubr.msk.bf16.vlgmr.msra.gmra.mrb[0].mxu0 %vm90_vm1, %v73_v5  ;;  %288 = vmatmul.mubr.msk.bf16.vlgmr.msra.gmra.mrb[0].mxu1 %vm90_vm1, %v68_v6  ;;  %p382_p13 = por %p381_p12, %p380_p11 }
  0x41   :  { %293 = vmatprep.mubr.msk.bf16.mxu0 %vm409_vm0, %v408_v0 }
  0x42   :  { %p383_p0 = pnand %p382_p13, %p376_p10 }
 0x113   :  { %v128_v7 = vpop.f32.mrb[0].mxu0  ;;  %v183_v8 = vpop.f32.mrb[0].mxu1 }
 0x114   :  { %v281_v10 = vpop.f32.mrb[1].mxu0  ;;  %v184_v11 = vadd.f32 %v183_v8, %v128_v7  ;;  %v289_v12 = vpop.f32.mrb[1].mxu1 }
 0x115   :  { %v131_v13 = vpop.f32.mrb[2].mxu0  ;;  %v186_v14 = vpop.f32.mrb[2].mxu1 }
 0x116   :  { %v282_v15 = vpop.f32.mrb[3].mxu0  ;;  %v196_v16 = vadd.f32 %v266_v9, %v184_v11  ;;  %v290_v17 = vpop.f32.mrb[3].mxu1 }
 0x118   :  { %v197_v18 = vmax.f32 %v196_v16, 0.0 }
 0x11a   :  { %v198_v19 = vpack.c.bf16 %v197_v18, %v197_v18 }
 0x11c   :  { %292 = vmatpush3.bf16.xpose.msra.mxu0 %v198_v19 }
 0x123   :  { %294 = vmatmul.mubr.bf16.vlgmr.msra.gmra.mrb[4].mxu0 %v199_v20 }
 0x1f6   :  { %v236_v22 = vpop.f32.mrb[4].mxu0 }
 0x1f7   :  { %v237_v23 = vadd.f32 %v236_v22, %v201_v21  ;;  %v295_v24 = vpop.f32.mrb[5].mxu0 }
 0x1f8   :  { %v239_v25 = vpop.f32.mrb[6].mxu0 }
 0x1f9   :  { %v296_v26 = vpop.f32.mrb[7].mxu0  ;;  %243 = vst.msk [vmem:[#allocation9] sm:$0x1] %vm242_vm2, %v237_v23 }
 0x1fa   :  { %386 = shalt.err (!%p383_p0)
}
 0x1fb   :  { %s387_s23 = scalar_lea.hbm %s527_s7, 16 }
 0x1fc   :  { %p388_p1 = scmp.ne.s32.totalorder %s527_s7, %s387_s23  ;;  %p391_p2 = scmp.lt.u32.totalorder %s387_s23, %s527_s7 }
 0x1fe   :  { %p393_p3 = pnand %p391_p2, %p388_p1 }
 0x200   :  { %396 = shalt.err (!%p393_p3)
}
 0x201   :  { %253 = dma.vmem_to_hbm [thread:$0]  %s251_s20, 16, %s527_s7, [#allocation5]  }
 0x202   :  { %401 = dma.done.wait [#allocation5], 16  }
 0x203   :  { %402 = vsyncadd [#allocation5], 4294967280 }
 0x204   :  { %257 = vsyncpa [#allocation4], 1 }
 0x205   :  { %258 = vsyncpa [#allocation7], 1 }
 0x206   :  { %259 = vsyncpa [#allocation5], 1 }

</bundles_post_ra>
